<compile_context>
chip_gen: v6e
topology: v6e:2x2x1
jax: 0.10.0
libtpu: 0.0.40
codegen_flags: <defaults>
</compile_context>

<pallas_src>
import functools

import jax
import jax.numpy as jnp
from jax.experimental import pallas as pl
from jax.experimental.pallas import tpu as pltpu

EPS = 1e-5


def _round_up(a, m):
    return ((a + m - 1) // m) * m


def _choose_row_tile(n_rows):
    # Largest tile (multiple of 8 sublanes) that still gives a multi-step grid
    # so the DMA pipeline is exercised; capped so double-buffered tiles stay
    # comfortably inside v7x's 64 MiB VMEM even for large D.
    for cand in (512, 256, 128, 64, 32, 16, 8):
        if n_rows >= 2 * cand:
            return cand
    return 8


def prenorm_linear_kernel(x_ref, gamma_ref, beta_ref, w_ref, b_ref, o_ref,
                          *, d_real):
    # x_ref:     (TN, Dp)  row tile (Dp = D padded to multiple of 128)
    # gamma_ref: (1, Dp)   LayerNorm weight  (zero in padded columns)
    # beta_ref:  (1, Dp)   LayerNorm bias    (zero in padded columns)
    # w_ref:     (Dp, Dp)  Linear weight, (in, out), bf16, zero-padded
    # b_ref:     (1, Dp)   Linear bias, zero-padded
    # o_ref:     (TN, Dp)
    x = x_ref[...].astype(jnp.float32)

    # One-pass LayerNorm statistics over the *real* feature count.  Padded
    # columns of x are zero, so the raw sums are unaffected by the padding.
    inv_d = jnp.float32(1.0 / d_real)
    s1 = jnp.sum(x, axis=-1, keepdims=True)
    s2 = jnp.sum(x * x, axis=-1, keepdims=True)
    mean = s1 * inv_d
    var = jnp.maximum(s2 * inv_d - mean * mean, 0.0)   # biased var, like torch
    inv = jax.lax.rsqrt(var + EPS)

    # f32 LayerNorm (v5e VPU has no bf16 path); padded gamma/beta are zero so
    # padded columns of xn are exactly zero.
    xn = (x - mean) * inv * gamma_ref[...] + beta_ref[...]

    # fn = Linear(dim, dim): y = xn @ W + b.  bf16 operands feed the MXU at
    # native rate on all generations; accumulate in f32.
    y = jnp.dot(xn.astype(jnp.bfloat16), w_ref[...],
                preferred_element_type=jnp.float32)
    y = y + b_ref[...]
    o_ref[...] = y.astype(o_ref.dtype)


def prenorm_linear(x, gamma, beta, w_in_out, b):
    """x: (B, S, D) -> (B, S, D).  PreNorm(dim, Linear(dim, dim))."""
    B, S, D = x.shape
    N = B * S

    # Lane-dense padding of the feature axis and sublane-aligned row tiling.
    Dp = _round_up(max(D, 128), 128)
    TN = _choose_row_tile(N)
    Np = _round_up(N, TN)
    grid_rows = Np // TN

    x2 = jnp.zeros((Np, Dp), dtype=x.dtype).at[:N, :D].set(x.reshape(N, D))
    gamma2 = jnp.zeros((1, Dp), jnp.float32).at[0, :D].set(
        gamma.astype(jnp.float32))
    beta2 = jnp.zeros((1, Dp), jnp.float32).at[0, :D].set(
        beta.astype(jnp.float32))
    w2 = jnp.zeros((Dp, Dp), jnp.bfloat16).at[:D, :D].set(
        w_in_out.astype(jnp.bfloat16))
    b2 = jnp.zeros((1, Dp), jnp.float32).at[0, :D].set(b.astype(jnp.float32))

    # VMEM budget: double-buffered input + output row tiles (f32) plus the
    # resident bf16 weight and the small vectors; headroom, capped at v7x's
    # 64 MiB physical VMEM.
    # TODO(synk): for very large D (e.g. >= 4096) add a second grid axis that
    # tiles W over output columns so the resident weight stays bounded.
    buf_bytes = (2 * 2 * TN * Dp * 4          # x + out, double-buffered, f32
                 + Dp * Dp * 2                # resident bf16 weight
                 + 8 * Dp * 4)                # gamma/beta/bias (+slack)
    vmem_limit = min(max(2 * buf_bytes, 32 << 20), 64 << 20)

    kernel = functools.partial(prenorm_linear_kernel, d_real=D)

    out = pl.pallas_call(
        kernel,
        out_shape=jax.ShapeDtypeStruct((Np, Dp), x.dtype),
        grid_spec=pltpu.PrefetchScalarGridSpec(
            num_scalar_prefetch=0,
            grid=(grid_rows,),
            in_specs=[
                pl.BlockSpec((TN, Dp), lambda i: (i, 0)),   # x row tile
                pl.BlockSpec((1, Dp), lambda i: (0, 0)),    # gamma (resident)
                pl.BlockSpec((1, Dp), lambda i: (0, 0)),    # beta  (resident)
                pl.BlockSpec((Dp, Dp), lambda i: (0, 0)),   # W     (resident)
                pl.BlockSpec((1, Dp), lambda i: (0, 0)),    # bias  (resident)
            ],
            out_specs=pl.BlockSpec((TN, Dp), lambda i: (i, 0)),
        ),
        compiler_params=pltpu.CompilerParams(
            dimension_semantics=("parallel",),
            vmem_limit_bytes=vmem_limit,
        ),
    )(x2, gamma2, beta2, w2, b2)

    return out[:N, :D].reshape(B, S, D)


def prenorm_linear_ref(x, gamma, beta, w_in_out, b):
    """Pure-JAX f32 reference matching torch: Linear(LayerNorm(x))."""
    mean = jnp.mean(x, axis=-1, keepdims=True)
    var = jnp.mean((x - mean) ** 2, axis=-1, keepdims=True)
    xn = (x - mean) / jnp.sqrt(var + EPS) * gamma + beta
    return xn @ w_in_out + b


if __name__ == "__main__":
    key = jax.random.PRNGKey(0)
    B, S, D = 2, 8, 32  # batch=2, seq=8, hidden/dim=32

    kx, kw, kb = jax.random.split(key, 3)
    x = jax.random.normal(kx, (B, S, D), dtype=jnp.float32)

    # LayerNorm params: default torch init (weight=1, bias=0).
    gamma = jnp.ones((D,), dtype=jnp.float32)
    beta = jnp.zeros((D,), dtype=jnp.float32)

    # fn = Linear(D, D).  torch Linear computes x @ W.T; we store W already
    # transposed as (in, out).
    w_in_out = jax.random.normal(kw, (D, D), dtype=jnp.float32) * 0.02
    b = jax.random.normal(kb, (D,), dtype=jnp.float32) * 0.01

    out = prenorm_linear(x, gamma, beta, w_in_out, b)
    out = jax.block_until_ready(out)

    ref = prenorm_linear_ref(x, gamma, beta, w_in_out, b)
    assert out.shape == (B, S, D)
    # Matmul operands are bf16 (f32 accumulate), so allow ~1e-2-level deltas.
    assert jnp.allclose(out, ref, atol=2e-2, rtol=2e-2), "mismatch vs reference"

    print("KERNEL_OK")
</pallas_src>

<mosaic_0001>
module attributes {stable_mosaic.version = 11 : i64} {
  func.func @prenorm_linear_kernel(%arg0: i32, %arg1: memref<8x128xf32, #tpu.memory_space<vmem>>, %arg2: memref<1x128xf32, #tpu.memory_space<vmem>>, %arg3: memref<1x128xf32, #tpu.memory_space<vmem>>, %arg4: memref<128x128xbf16, #tpu.memory_space<vmem>>, %arg5: memref<1x128xf32, #tpu.memory_space<vmem>>, %arg6: memref<8x128xf32, #tpu.memory_space<vmem>>) attributes {dimension_semantics = [#tpu.dimension_semantics<parallel>], iteration_bounds = array<i64: 2>, scalar_prefetch = 0 : i64, scratch_operands = 0 : i64, tpu.core_type = #tpu.core_type<tc>, window_params = [{transform_indices = @transform_0, window_bounds = array<i64: 8, 128>}, {pipeline_mode = #tpu.pipeline_mode<synchronous>, transform_indices = @transform_1, window_bounds = array<i64: 1, 128>}, {pipeline_mode = #tpu.pipeline_mode<synchronous>, transform_indices = @transform_2, window_bounds = array<i64: 1, 128>}, {pipeline_mode = #tpu.pipeline_mode<synchronous>, transform_indices = @transform_3, window_bounds = array<i64: 128, 128>}, {pipeline_mode = #tpu.pipeline_mode<synchronous>, transform_indices = @transform_4, window_bounds = array<i64: 1, 128>}, {transform_indices = @transform_5, window_bounds = array<i64: 8, 128>}]} {
    %c0 = arith.constant 0 : index
    %c0_0 = arith.constant 0 : index
    %0 = vector.load %arg1[%c0, %c0_0] : memref<8x128xf32, #tpu.memory_space<vmem>>, vector<8x128xf32>
    %cst = arith.constant dense<0.000000e+00> : vector<8xf32>
    %1 = vector.multi_reduction <add>, %0, %cst [1] : vector<8x128xf32> to vector<8xf32>
    %2 = vector.shape_cast %1 : vector<8xf32> to vector<8x1xf32>
    %3 = arith.mulf %0, %0 : vector<8x128xf32>
    %cst_1 = arith.constant dense<0.000000e+00> : vector<8xf32>
    %4 = vector.multi_reduction <add>, %3, %cst_1 [1] : vector<8x128xf32> to vector<8xf32>
    %5 = vector.shape_cast %4 : vector<8xf32> to vector<8x1xf32>
    %cst_2 = arith.constant 3.125000e-02 : f32
    %6 = vector.broadcast %cst_2 : f32 to vector<8x1xf32>
    %7 = arith.mulf %2, %6 : vector<8x1xf32>
    %cst_3 = arith.constant 3.125000e-02 : f32
    %8 = vector.broadcast %cst_3 : f32 to vector<8x1xf32>
    %9 = arith.mulf %5, %8 : vector<8x1xf32>
    %10 = arith.mulf %7, %7 : vector<8x1xf32>
    %11 = arith.subf %9, %10 : vector<8x1xf32>
    %cst_4 = arith.constant 0.000000e+00 : f32
    %12 = vector.broadcast %cst_4 : f32 to vector<8x1xf32>
    %13 = arith.maximumf %11, %12 : vector<8x1xf32>
    %cst_5 = arith.constant 9.99999974E-6 : f32
    %14 = vector.broadcast %cst_5 : f32 to vector<8x1xf32>
    %15 = arith.addf %13, %14 : vector<8x1xf32>
    %16 = math.rsqrt %15 : vector<8x1xf32>
    %17 = vector.broadcast %7 : vector<8x1xf32> to vector<8x128xf32>
    %18 = arith.subf %0, %17 : vector<8x128xf32>
    %19 = vector.broadcast %16 : vector<8x1xf32> to vector<8x128xf32>
    %20 = arith.mulf %18, %19 : vector<8x128xf32>
    %c0_6 = arith.constant 0 : index
    %c0_7 = arith.constant 0 : index
    %21 = vector.load %arg2[%c0_6, %c0_7] : memref<1x128xf32, #tpu.memory_space<vmem>>, vector<1x128xf32>
    %22 = vector.broadcast %21 : vector<1x128xf32> to vector<8x128xf32>
    %23 = arith.mulf %20, %22 : vector<8x128xf32>
    %c0_8 = arith.constant 0 : index
    %c0_9 = arith.constant 0 : index
    %24 = vector.load %arg3[%c0_8, %c0_9] : memref<1x128xf32, #tpu.memory_space<vmem>>, vector<1x128xf32>
    %25 = vector.broadcast %24 : vector<1x128xf32> to vector<8x128xf32>
    %26 = arith.addf %23, %25 : vector<8x128xf32>
    %27 = arith.truncf %26 : vector<8x128xf32> to vector<8x128xbf16>
    %c0_10 = arith.constant 0 : index
    %c0_11 = arith.constant 0 : index
    %28 = vector.load %arg4[%c0_10, %c0_11] : memref<128x128xbf16, #tpu.memory_space<vmem>>, vector<128x128xbf16>
    %cst_12 = arith.constant dense<0.000000e+00> : vector<8x128xf32>
    %29 = tpu.matmul %27, %28, %cst_12 {dimension_numbers = #tpu.dot_dimension_numbers<[1], [0], [0], [1], [0, 0, 1, 1], [], []>} : vector<8x128xbf16>, vector<128x128xbf16>, vector<8x128xf32> -> vector<8x128xf32>
    %c0_13 = arith.constant 0 : index
    %c0_14 = arith.constant 0 : index
    %30 = vector.load %arg5[%c0_13, %c0_14] : memref<1x128xf32, #tpu.memory_space<vmem>>, vector<1x128xf32>
    %31 = vector.broadcast %30 : vector<1x128xf32> to vector<8x128xf32>
    %32 = arith.addf %29, %31 : vector<8x128xf32>
    %c0_15 = arith.constant 0 : index
    %c0_16 = arith.constant 0 : index
    %33 = vector.load %arg6[%c0_15, %c0_16] : memref<8x128xf32, #tpu.memory_space<vmem>>, vector<8x128xf32>
    tpu.vector_store %arg6[%c0_15, %c0_16], %32 {strides = array<i32>} : memref<8x128xf32, #tpu.memory_space<vmem>>, vector<8x128xf32>,
    return
  }
  func.func @transform_0(%arg0: i32) -> (i32, i32) {
    %c0_i32 = arith.constant 0 : i32
    %c0_i32_0 = arith.constant 0 : i32
    return %arg0, %c0_i32 : i32, i32
  }
  func.func @transform_1(%arg0: i32) -> (i32, i32) {
    %c0_i32 = arith.constant 0 : i32
    %c0_i32_0 = arith.constant 0 : i32
    %c0_i32_1 = arith.constant 0 : i32
    return %c0_i32, %c0_i32_0 : i32, i32
  }
  func.func @transform_2(%arg0: i32) -> (i32, i32) {
    %c0_i32 = arith.constant 0 : i32
    %c0_i32_0 = arith.constant 0 : i32
    %c0_i32_1 = arith.constant 0 : i32
    return %c0_i32, %c0_i32_0 : i32, i32
  }
  func.func @transform_3(%arg0: i32) -> (i32, i32) {
    %c0_i32 = arith.constant 0 : i32
    %c0_i32_0 = arith.constant 0 : i32
    %c0_i32_1 = arith.constant 0 : i32
    return %c0_i32, %c0_i32_0 : i32, i32
  }
  func.func @transform_4(%arg0: i32) -> (i32, i32) {
    %c0_i32 = arith.constant 0 : i32
    %c0_i32_0 = arith.constant 0 : i32
    %c0_i32_1 = arith.constant 0 : i32
    return %c0_i32, %c0_i32_0 : i32, i32
  }
  func.func @transform_5(%arg0: i32) -> (i32, i32) {
    %c0_i32 = arith.constant 0 : i32
    %c0_i32_0 = arith.constant 0 : i32
    return %arg0, %c0_i32 : i32, i32
  }
}

</mosaic_0001>

<bundles_post_ra>
// kernel: tpu_custom_call.1
= control target key start
LH: loop header
LB: loop body
LE: loop exit
PB: predicated region body
PF: predicated region fallthrough
CT: control target
= control target key end

     0   :  { %10 = vsyncpa [#allocation3], 0  ;;  %s959_s0 = inlined_call_operand.hbm [shape: f32[16,128], index: 0, kind: input, shape index: {}]   ;;  %s960_s1 = inlined_call_operand.vmem [shape: f32[1,128], index: 1, kind: input, shape index: {}]   ;;  %s961_s2 = inlined_call_operand.vmem [shape: f32[1,128], index: 2, kind: input, shape index: {}]   ;;  %s962_s3 = inlined_call_operand.hbm [shape: bf16[128,128], index: 3, kind: input, shape index: {}]   ;;  %s963_s4 = inlined_call_operand.vmem [shape: f32[1,128], index: 4, kind: input, shape index: {}]   ;;  %s964_s5 = inlined_call_operand.hbm [shape: f32[16,128], index: 5, kind: output, shape index: {}]  }
   0x1   :  { %12 = vsyncpa [#allocation3 + $0x1], 0 }
   0x2   :  { %13 = vsyncpa [#allocation6], 0 }
   0x3   :  { %14 = vsyncpa [#allocation4], 0 }
   0x4   :  { %16 = vsyncpa [#allocation4 + $0x1], 0  ;;  %s780_s18 = smov 0   ;;  %s782_s19 = smov 0  }
   0x5   :  { %s784_s20 = smov 0   ;;  %s786_s21 = smov 0  }
   0x6 LB: > { %s801_s22 = sadd.s32 4294967295, %s741_s21   ;;  %s494_s23 = sadd.s32 4294967294, %s741_s21   ;;  %s741_s21 = sphi %s786_s21, %s986_s21   ;;  %s737_s20 = sphi %s784_s20, %s985_s20   ;;  %s733_s19 = sphi %s782_s19, %s984_s19   ;;  %s729_s18 = sphi %s780_s18, %s983_s18  }
   0x7   : > { %p42_p0 = scmp.ne.s32.totalorder %s733_s19, %s729_s18  ;;  %p965_p1 = scmp.eq.s32.totalorder %s801_s22, 0 }
   0x8   : > { %p156_p3 = scmp.eq.s32.totalorder %s494_s23, 1  ;;  %p495_p5 = scmp.ge.s32.totalorder %s741_s21, 1 }
   0x9   : > { %p810_p4 = por %p965_p1, %p42_p0  ;;  %p163_p7 = scmp.lt.s32.totalorder %s741_s21, 3 }
   0xa   : > { %p815_p6 = por %p156_p3, %p42_p0  ;;  %s743_s27 = smov [#allocation5]  }
   0xb   : > { %s969_s24 = scalar_select %p810_p4, 1, 0 }
   0xc   : > { %s970_s25 = scalar_select %p815_p6, 1, 0 }
   0xd   : > { %p820_p8 = pnand %p495_p5, %p163_p7  ;;  %s181_s28 = sshll.u32 %s743_s27, 4  ;;  %s182_s28 = int_to_ptr.vmem [resolvable:$true] %s181_s28 }
   0xe   : > { %s834_s30 = sadd.s32 1, %s741_s21   ;;  %s29_s6 = sadd.s32 1, %s737_s20 }
   0xf   : > { %s971_s26 = scalar_select %p820_p8, 1, 0 }
  0x10   : > { %p556_p9 = pneg %p820_p8  ;;  %s26_s7 = ssub.s32 %s741_s21, %s834_s30 }
  0x11   : > { %s630_s8 = scalar_lea.vmem %s182_s28, 1024  ;;  %p638_p5 = scmp.lt.s32.totalorder %s182_s28, %s182_s28 }
  0x12   : > { %p829_p11 = pnand %p556_p9, %p965_p1  ;;  %p631_p13 = scmp.ne.s32.totalorder %s182_s28, %s630_s8 }
  0x13   : > { %p639_p7 = scmp.lt.s32.totalorder %s630_s8, %s630_s8 }
  0x14   : > { %p621_p12 = pneg %p829_p11 }
  0x15   : > { %p640_p10 = por %p639_p7, %p638_p5 }
  0x16   : > { %p633_p0 = pnand %p631_p13, %p621_p12 }
  0x18   : > { %p634_p3 = pneg %p633_p0 }
  0x1a   : > { %p641_p2 = pnand %p640_p10, %p634_p3 }
  0x1c   : > { %644 = shalt.err (!%p641_p2)
}
  0x1d   : > { %s744_s9 = smov 64   ;;  %s745_s10 = smov 4  }
  0x1e   : > { %559 = dma.hbm_to_vmem [thread:$0]  (!%p829_p11), %s962_s3, 1024, %s182_s28, [#allocation6], %s744_s9, %s744_s9, %s745_s10  }
  0x1f   : > { %p27_p9 = scmp.eq.s32.totalorder %s26_s7, 0  ;;  %p36_p12 = scmp.ne.s32.totalorder %s737_s20, %s733_s19 }
  0x20   : > { %p37_p10 = scmp.eq.s32.totalorder %s741_s21, 0  ;;  %p569_p2 = scmp.lt.s32.totalorder %s741_s21, 2 }
  0x21   : > { %s851_s13 = scalar_select %p27_p9, %s737_s20, %s29_s6  }
  0x22   : > { %p38_p13 = por %p37_p10, %p36_p12  ;;  %p973_p0 = scmp.eq.s32.totalorder %s801_s22, 1 }
  0x23   : > { %s198_s15 = sand.u32 1, %s737_s20   ;;  %s499_s16 = sshll.u32 %s741_s21, 7 }
  0x24   : > { %p855_p3 = por %p973_p0, %p36_p12  ;;  %s498_s17 = sshll.u32 %s198_s15, 3 }
  0x25   : > { %s864_s29 = scalar_lea.hbm %s959_s0, %s499_s16  ;;  %s202_s28 = scalar_lea.vmem [#allocation2], %s498_s17 }
  0x26   : > { %s974_s14 = scalar_select %p855_p3, 1, 0 }
  0x27   : > { %s209_s6 = sshll.u32 %s202_s28, 4  ;;  %p866_p11 = pnand %p569_p2, %p38_p13  ;;  %s210_s6 = int_to_ptr.vmem [resolvable:$true] %s209_s6 }
  0x28   : > { %s199_s8 = scalar_lea.sflag [#allocation3], %s198_s15  ;;  %s645_s9 = scalar_lea.hbm %s864_s29, 128 }
  0x29   : > { %p646_p5 = scmp.ne.s32.totalorder %s864_s29, %s645_s9  ;;  %p647_p7 = pneg %p866_p11 }
  0x2a   : > { %s650_s12 = scalar_lea.hbm %s959_s0, 256  ;;  %p651_p10 = scmp.lt.s32.totalorder %s864_s29, %s959_s0 }
  0x2b   : > { %p648_p9 = pnand %p647_p7, %p646_p5  ;;  %p652_p2 = scmp.lt.s32.totalorder %s650_s12, %s645_s9 }
  0x2d   : > { %p649_p12 = pneg %p648_p9  ;;  %p653_p13 = por %p652_p2, %p651_p10 }
  0x2f   : > { %p654_p0 = pnand %p653_p13, %p649_p12 }
  0x31   : > { %657 = shalt.err (!%p654_p0)
}
  0x32   : > { %s658_s23 = scalar_lea.vmem %s210_s6, 128  ;;  %s746_s15 = smov [#allocation2]  }
  0x33   : > { %p659_p1 = scmp.ne.s32.totalorder %s210_s6, %s658_s23  ;;  %s663_s27 = sshll.u32 %s746_s15, 4  ;;  %s664_s27 = int_to_ptr.vmem [resolvable:$false] %s663_s27 }
  0x34   : > { %s665_s28 = scalar_lea.vmem %s664_s27, 256  ;;  %p666_p5 = scmp.lt.s32.totalorder %s210_s6, %s664_s27 }
  0x35   : > { %p661_p6 = pnand %p659_p1, %p647_p7  ;;  %p667_p9 = scmp.lt.s32.totalorder %s665_s28, %s658_s23 }
  0x37   : > { %p662_p3 = pneg %p661_p6  ;;  %p668_p4 = por %p667_p9, %p666_p5 }
  0x39   : > { %p669_p8 = pnand %p668_p4, %p662_p3 }
  0x3b   : > { %672 = shalt.err (!%p669_p8)
}
  0x3c   : > { %563 = dma.hbm_to_vmem [thread:$0]  (!%p866_p11), %s864_s29, 128, %s210_s6, %s199_s8  }
  0x3d   : > { %p976_p12 = scmp.ne.s32.totalorder %s971_s26, 0 }
  0x3e   : > { %s887_s9 = sand.u32 (!%p976_p12), 1, %s733_s19   ;;  %p977_p1 = scmp.ne.s32.totalorder (!%p976_p12), %s969_s24, 0 }
  0x3f   : > { %218 = sbr.rel (%p976_p12) target bundleno = 454 (0x1c6), region = 40  ;;  %s501_s10 = sshll.u32 (!%p976_p12), %s887_s9, 3 }
  0x40   : > { %s221_s11 = scalar_lea.sflag (!%p976_p12), [#allocation3], %s887_s9  ;;  %s224_s12 = scalar_lea.vmem (!%p976_p12), [#allocation2], %s501_s10 }
  0x44   : > { %716 = dma.done.wait (%p977_p1), %s221_s11, 128  }
  0x45   : > { %718 = vsyncadd (%p977_p1), %s221_s11, 4294967168  ;;  %p978_p4 = scmp.eq.s32.totalorder %s801_s22, 0 }
  0x47   : > { %720 = dma.done.wait (%p978_p4), [#allocation6], 1024   ;;  %p979_p6 = pmov %p978_p4 }
  0x48   : > { %v256_v0 = vld [vmem:[%s224_s12] sm:$0xff]  ;;  %v747_v3 = vmov 0.0   ;;  %v611_v5 = vld [vmem:[#allocation5 + $0x28] sm:$0xff]   ;;  %v612_v6 = vld [vmem:[#allocation5 + $0x20] sm:$0xff]   ;;  %vm748_vm0 = vmmov 0   ;;  %s516_s16 = sshll.u32 %s801_s22, 7 }
  0x49   : > { %722 = vsyncadd (%p979_p6), [#allocation6], 4294966272  ;;  %257 = vadd.xlane.f32.xlu0 %v256_v0  ;;  %v259_v1 = vmul.f32 %v256_v0, %v256_v0  ;;  %v609_v2 = vld [vmem:[#allocation5 + $0x38] sm:$0xff]   ;;  %528 = vmatprep.subr.bf16.mxu0 %v747_v3  ;;  %v610_v4 = vld [vmem:[#allocation5 + $0x30] sm:$0xff]   ;;  %s254_s17 = scalar_lea.vmem [#allocation7], %s501_s10  ;;  %s916_s28 = scalar_lea.hbm %s964_s5, %s516_s16 }
  0x4a   : > { %529 = vmatpush3.bf16.msra.mxu0 %v609_v2  ;;  %544 = vmatprep.mubr.msk.bf16.mxu0 %vm748_vm0, %v747_v3  ;;  %v613_v7 = vld [vmem:[#allocation5 + $0x18] sm:$0xff]   ;;  %v614_v8 = vld [vmem:[#allocation5 + $0x10] sm:$0xff]   ;;  %v615_v9 = vld [vmem:[#allocation5 + $0x8] sm:$0xff]   ;;  %s414_s23 = sshll.u32 %s254_s17, 4  ;;  %s401_s11 = scalar_lea.sflag [#allocation4], %s887_s9  ;;  %s918_s23 = int_to_ptr.vmem [resolvable:$true] %s414_s23 }
  0x4b   : > { %530 = vmatprep.subr.bf16.mxu0 %v747_v3  ;;  %v616_v10 = vld [vmem:[#allocation5] sm:$0xff]   ;;  %v504_v21 = vld [vmem:[%s960_s1] ss:$0 sm:$0xff]  ;;  %s673_s22 = scalar_lea.vmem %s918_s23, 128  ;;  %p980_p3 = scmp.ne.s32.totalorder %s974_s14, 0 }
  0x4c   : > { %v505_v23 = vld [vmem:[%s961_s2] ss:$0 sm:$0xff]  ;;  %p674_p8 = scmp.ne.s32.totalorder %s918_s23, %s673_s22  ;;  %s749_s10 = smov [#allocation7]  }
  0x4d   : > { %260 = vadd.xlane.f32.xlu0 %v259_v1  ;;  %v506_v27 = vld [vmem:[%s963_s4] ss:$0 sm:$0xff]  ;;  %s677_s12 = sshll.u32 %s749_s10, 4  ;;  %s678_s12 = int_to_ptr.vmem [resolvable:$false] %s677_s12 }
  0x4e   : > { %531 = vmatpush3.bf16.msra.mxu0 %v610_v4  ;;  %p675_p11 = pnand %p674_p8, %p980_p3  ;;  %s679_s24 = scalar_lea.vmem %s678_s12, 256 }
  0x4f   : > { %532 = vmatprep.subr.bf16.mxu0 %v747_v3  ;;  %p680_p10 = scmp.lt.s32.totalorder %s918_s23, %s678_s12  ;;  %p681_p2 = scmp.lt.s32.totalorder %s679_s24, %s673_s22 }
  0x50   : > { %p676_p7 = pneg %p675_p11 }
  0x51   : > { %p682_p13 = por %p681_p2, %p680_p10 }
  0x52   : > { %533 = vmatpush3.bf16.msra.mxu0 %v611_v5 }
  0x53   : > { %534 = vmatprep.subr.bf16.mxu0 %v747_v3  ;;  %p683_p0 = pnand %p682_p13, %p676_p7 }
  0x56   : > { %535 = vmatpush3.bf16.msra.mxu0 %v612_v6 }
  0x57   : > { %536 = vmatprep.subr.bf16.mxu0 %v747_v3 }
  0x5a   : > { %537 = vmatpush3.bf16.msra.mxu0 %v613_v7 }
  0x5b   : > { %538 = vmatprep.subr.bf16.mxu0 %v747_v3 }
  0x5e   : > { %539 = vmatpush3.bf16.msra.mxu0 %v614_v8 }
  0x5f   : > { %540 = vmatprep.subr.bf16.mxu0 %v747_v3 }
  0x62   : > { %541 = vmatpush3.bf16.msra.mxu0 %v615_v9 }
  0x63   : > { %542 = vmatprep.subr.bf16.mxu0 %v747_v3 }
  0x66   : > { %543 = vmatpush3.bf16.msra.mxu0 %v616_v10 }
  0xd2   : > { %v258_v11 = vpop.xlane.xlu0 %257 }
  0xd3   : > { %v262_v12 = vmul.f32 0.03125, %v258_v11 }
  0xd5   : > { %v264_v14 = vmul.f32 %v262_v12, %v262_v12  ;;  %v269_v19 = vsub.f32 %v256_v0, %v262_v12 }
  0xd6   : > { %v261_v13 = vpop.xlane.xlu0 %260 }
  0xd7   : > { %v263_v15 = vmul.f32 0.03125, %v261_v13 }
  0xd9   : > { %v265_v16 = vsub.f32 %v263_v15, %v264_v14 }
  0xdb   : > { %v266_v17 = vmax.f32 %v265_v16, 0.0 }
  0xdd   : > { %v267_v18 = vadd.f32 1e-05, %v266_v17 }
  0xdf   : > { %617 = vrsqrt.f32 %v267_v18 }
  0xec   : > { %v618_v20 = vpop.eup %617 }
  0xed   : > { %v270_v22 = vmul.f32 %v618_v20, %v269_v19 }
  0xef   : > { %v278_v24 = vmul.f32 %v504_v21, %v270_v22 }
  0xf1   : > { %v286_v25 = vadd.f32 %v505_v23, %v278_v24 }
  0xf3   : > { %v287_v26 = vpack.c.bf16 %v286_v25, %v286_v25 }
  0xf5   : > { %545 = vmatmul.mubr.bf16.vlgmr.msra.gmra.mxu0 %v287_v26 }
 0x1b5   : > { %v393_v28 = vpop.f32.mrf.mxu0 }
 0x1b6   : > { %v394_v29 = vadd.f32 %v506_v27, %v393_v28 }
 0x1b7   : > { %v546_v30 = vpop.f32.mrf.mxu0 }
 0x1b8   : > { %399 = vst [vmem:[%s254_s17] sm:$0xff] %v394_v29 }
 0x1b9   : > { %v396_v31 = vpop.f32.mrf.mxu0 }
 0x1ba   : > { %686 = shalt.err (!%p683_p0)
}
 0x1bb   : > { %s687_s26 = scalar_lea.hbm %s916_s28, 128  ;;  %s691_s6 = scalar_lea.hbm %s964_s5, 256 }
 0x1bc   : > { %p688_p5 = scmp.ne.s32.totalorder %s916_s28, %s687_s26  ;;  %p692_p1 = scmp.lt.s32.totalorder %s916_s28, %s964_s5 }
 0x1bd   : > { %p693_p4 = scmp.lt.s32.totalorder %s691_s6, %s687_s26 }
 0x1be   : > { %p689_p9 = pnand %p688_p5, %p980_p3 }
 0x1bf   : > { %p694_p6 = por %p693_p4, %p692_p1 }
 0x1c0   : > { %p690_p12 = pneg %p689_p9 }
 0x1c2   : > { %p695_p8 = pnand %p694_p6, %p690_p12 }
 0x1c4   : > { %698 = shalt.err (!%p695_p8)
}
 0x1c5   : > { %554 = dma.vmem_to_hbm [thread:$0]  (%p980_p3), %s918_s23, 128, %s916_s28, %s401_s11   ;;  %v547_v32 = vpop.f32.mrf.mxu0 }
 0x1c6 PF: > { %s426_s16 = sand.u32 1, %s729_s18   ;;  %p981_p11 = scmp.ne.s32.totalorder %s970_s25, 0 }
 0x1c7   : > { %p982_p7 = scmp.ge.s32.totalorder %s741_s21, 2  ;;  %s427_s17 = scalar_lea.sflag [#allocation4], %s426_s16 }
 0x1c9   : > { %p565_p10 = pnand %p982_p7, %p981_p11 }
 0x1cb   : > { %p566_p2 = pneg %p565_p10 }
 0x1cd   : > { %724 = dma.done.wait (%p566_p2), %s427_s17, 128  }
 0x1ce   : > { %726 = vsyncadd (%p566_p2), %s427_s17, 4294967168  ;;  %p19_p13 = scmp.ge.s32.totalorder %s834_s30, 4   ;;  %s983_s18 = smov %s733_s19 }
 0x1cf   : > { %s984_s19 = smov %s737_s20  ;;  %s985_s20 = smov %s851_s13 }
 0x1d0   : > { %s986_s21 = smov %s834_s30  ;;  %21 = sbr.rel (!%p19_p13) target bundleno = 6 (0x6), region = 89 }
 0x1d5   :  { %432 = vsyncpa [#allocation3], 1 }
 0x1d6   :  { %434 = vsyncpa [#allocation3 + $0x1], 1 }
 0x1d7   :  { %435 = vsyncpa [#allocation6], 1 }
 0x1d8   :  { %436 = vsyncpa [#allocation4], 1 }
 0x1d9   :  { %438 = vsyncpa [#allocation4 + $0x1], 1 }

</bundles_post_ra>
